<compile_context>
chip_gen: v7x
topology: tpu7x:2x2x1
jax: 0.10.0
libtpu: 0.0.40
codegen_flags: <defaults>
</compile_context>

<pallas_src>
import functools

import jax
import jax.numpy as jnp
from jax.experimental import pallas as pl
from jax.experimental.pallas import tpu as pltpu


def _reg_pos_kernel(pred_ref, lab0_ref, lab1_ref, out_ref,
                    *, n_rows, n_block, ragged):
    """One lane-dense block -> one (8,128) tile: loss in sublanes 0-3, weight in 4-7."""
    pred = pred_ref[...].astype(jnp.float32)
    lab0 = lab0_ref[...].astype(jnp.float32)
    lab1 = lab1_ref[...].astype(jnp.float32)

    denom = lab0 + jnp.float32(1e-10)
    diff = (pred - lab0) / denom          # single exact divide (== pred/d - lab0/d)

    if ragged:  # static flag: only the non-dividing row-block case pays for this
        row = jax.lax.broadcasted_iota(jnp.int32, pred.shape, 0)
        valid = (pl.program_id(0) * n_block + row) < n_rows
        zero = jnp.float32(0.0)
        diff = jnp.where(valid, diff, zero)   # forces sl1 = 0 on garbage rows
        lab1 = jnp.where(valid, lab1, zero)   # forces weight = 0 on garbage rows

    adiff = jnp.abs(diff)
    sl1 = jnp.where(adiff < jnp.float32(1.0),
                    jnp.float32(0.5) * diff * diff,
                    adiff - jnp.float32(0.5))

    part_loss = jnp.sum(lab1 * sl1)
    part_w = jnp.sum(lab1)

    # One merged lane-dense partial tile per step (halves output DMAs).
    srow = jax.lax.broadcasted_iota(jnp.int32, (8, 128), 0)
    tile = jnp.where(srow < 4, part_loss, part_w)
    out_ref[...] = tile.reshape(1, 1, 8, 128)


def _vmem_budget(target_block_bytes, vmem_limit_bytes):
    """Per-generation defaults: bigger blocks on 128 MiB-VMEM chips (v5e/v6e)."""
    if target_block_bytes is not None and vmem_limit_bytes is not None:
        return target_block_bytes, vmem_limit_bytes
    try:
        vmem_cap = pltpu.get_tpu_info().vmem_capacity_bytes
    except Exception:
        vmem_cap = 64 * 1024 * 1024          # conservative (v7x-sized) fallback
    big_vmem = vmem_cap >= 100 * 1024 * 1024
    if target_block_bytes is None:
        target_block_bytes = (6 if big_vmem else 3) * 1024 * 1024
    if vmem_limit_bytes is None:
        # 3 inputs x 2 buffers x block + small output tiles + headroom.
        vmem_limit_bytes = (48 if big_vmem else 28) * 1024 * 1024
    return target_block_bytes, vmem_limit_bytes


def reg_pos(h_pred, h_label, *, target_block_bytes=None, vmem_limit_bytes=None,
            lane_block_cap=16384, lane_block_floor=2048):
    """h_pred: [N, C, H, W], h_label: [N, CL>=2, H, W] (NCHW). Returns scalar f32."""
    N, C, H, W = h_pred.shape
    CL = h_label.shape[1]
    assert CL >= 2, "h_label needs at least 2 channels (target, weight)"
    HW = H * W
    itemsize = h_pred.dtype.itemsize
    target_block_bytes, vmem_limit_bytes = _vmem_budget(target_block_bytes,
                                                        vmem_limit_bytes)

    hw_pad128 = -(-HW // 128) * 128
    cap128 = max(128, (lane_block_cap // 128) * 128)

    # ---- lane blocking: zero-copy view when possible, slice+pad otherwise ----
    use_copy_path = (HW % 128 != 0)
    hw_block = 128
    if not use_copy_path:
        # Largest multiple of 128 that divides HW and is <= cap.
        d = min(HW, cap128)
        while d >= 128:
            if HW % d == 0:
                hw_block = d
                break
            d -= 128
        # Degenerate factorization (tiny divisor) -> pay the small copy instead.
        if hw_block < min(lane_block_floor, HW):
            use_copy_path = True

    if use_copy_path:
        hw_block = min(hw_pad128, cap128)
        grid_hw = -(-HW // hw_block)
        cols = grid_hw * hw_block            # per-channel padded column count
    else:
        grid_hw = HW // hw_block
        cols = HW

    # ---- row blocking (dtype-aware sublane alignment) ----
    sub = max(8, 32 // itemsize)             # 8 f32, 16 bf16, 32 int8/fp8
    rows_budget = max(1, target_block_bytes // (hw_block * itemsize))
    if N <= rows_budget:
        n_block = N                          # block == full dim (allowed)
    else:
        n_block = max(sub, (rows_budget // sub) * sub)
    grid_n = -(-N // n_block)

    # ---- guarantee >= 2 grid steps when the data allows it (v7x megacore) ----
    if grid_n * grid_hw == 1:
        exact = 0
        d = ((N // 2) // sub) * sub
        while d >= sub:                      # exact (non-ragged) row split
            if N % d == 0:
                exact = d
                break
            d -= sub
        if exact:
            n_block = exact
            grid_n = N // n_block
        elif (not use_copy_path) and HW >= 256 and HW % 256 == 0:
            hw_block = HW // 2
            grid_hw = 2
        elif use_copy_path and hw_pad128 >= 256:
            hw_block = ((hw_pad128 // 2 + 127) // 128) * 128
            grid_hw = 2
            cols = grid_hw * hw_block
        elif N >= 2 * sub:                   # last resort: ragged row split
            n_block = ((N // 2 + sub - 1) // sub) * sub
            grid_n = -(-N // n_block)
        # else: problem too small to benefit from a second core; keep (1, 1)
    ragged = (grid_n * n_block) != N

    # ---- build kernel inputs / BlockSpecs ----
    if use_copy_path:
        # Slice only the 3 needed channels BEFORE padding (no full-tensor pad).
        pred_in = h_pred[:, 0, :, :].reshape(N, HW)
        lab0_in = h_label[:, 0, :, :].reshape(N, HW)
        lab1_in = h_label[:, 1, :, :].reshape(N, HW)
        if cols != HW:
            # Zero padding is neutral: pred=lab0=lab1=0 -> diff=0, sl1=0, weight=0.
            padw = ((0, 0), (0, cols - HW))
            pred_in = jnp.pad(pred_in, padw)
            lab0_in = jnp.pad(lab0_in, padw)
            lab1_in = jnp.pad(lab1_in, padw)
        row_spec = pl.BlockSpec((n_block, hw_block), lambda i, j: (i, j))
        in_specs = [row_spec, row_spec, row_spec]
        args = (pred_in, lab0_in, lab1_in)
    else:
        # Free reshapes; channels selected purely via index_map column offsets.
        pred_in = h_pred.reshape(N, C * HW)
        lab_in = h_label.reshape(N, CL * HW)
        ch1_off = HW // hw_block             # block-column offset of label channel 1
        row_spec = pl.BlockSpec((n_block, hw_block), lambda i, j: (i, j))
        lab1_spec = pl.BlockSpec((n_block, hw_block),
                                 lambda i, j, off=ch1_off: (i, off + j))
        in_specs = [row_spec, row_spec, lab1_spec]
        args = (pred_in, lab_in, lab_in)

    kernel = functools.partial(_reg_pos_kernel,
                               n_rows=N, n_block=n_block, ragged=ragged)

    parts = pl.pallas_call(
        kernel,
        out_shape=jax.ShapeDtypeStruct((grid_n, grid_hw, 8, 128), jnp.float32),
        grid=(grid_n, grid_hw),
        in_specs=in_specs,
        out_specs=pl.BlockSpec((1, 1, 8, 128), lambda i, j: (i, j, 0, 0)),
        compiler_params=pltpu.CompilerParams(
            dimension_semantics=("parallel", "parallel"),  # megacore on v7x
            vmem_limit_bytes=vmem_limit_bytes,
        ),
    )(*args)

    total_loss = jnp.sum(parts[:, :, 0, 0])   # loss partials (sublanes 0-3)
    total_w = jnp.sum(parts[:, :, 4, 0])      # weight partials (sublanes 4-7)
    return total_loss / jnp.maximum(jnp.float32(1.0), total_w)


def _reg_pos_ref(h_pred, h_label):
    pred = h_pred[:, 0, :, :].astype(jnp.float32)
    lab0 = h_label[:, 0, :, :].astype(jnp.float32)
    lab1 = h_label[:, 1, :, :].astype(jnp.float32)
    denom = lab0 + 1e-10
    d = pred / denom - lab0 / denom
    ad = jnp.abs(d)
    sl1 = jnp.where(ad < 1.0, 0.5 * d * d, ad - 0.5)
    return jnp.sum(lab1 * sl1) / jnp.maximum(1.0, jnp.sum(lab1))


def _make_inputs(key, N, C, H, W):
    k1, k2, k3 = jax.random.split(key, 3)
    h_pred = jax.random.normal(k1, (N, C, H, W), dtype=jnp.float32) * 2.0
    lab0 = jnp.abs(jax.random.normal(k2, (N, H, W), dtype=jnp.float32)) + 0.1
    lab1 = (jax.random.uniform(k3, (N, H, W)) > 0.5).astype(jnp.float32)
    rest = jnp.zeros((N, max(C - 2, 0), H, W), dtype=jnp.float32)
    h_label = jnp.concatenate([lab0[:, None], lab1[:, None], rest], axis=1)
    return h_pred, h_label


if __name__ == "__main__":
    key = jax.random.PRNGKey(0)
    ka, kb, kc = jax.random.split(key, 3)

    # 1) 128-aligned HW -> zero-copy view path (grid split for megacore).
    h_pred, h_label = _make_inputs(ka, 2, 4, 16, 16)
    out = reg_pos(h_pred, h_label)
    jax.block_until_ready(out)
    ref = _reg_pos_ref(h_pred, h_label)
    assert jnp.allclose(out, ref, rtol=1e-5, atol=1e-5), (out, ref)

    # 2) Non-128-aligned HW -> slice-then-pad path (only 3 channels copied).
    h_pred2, h_label2 = _make_inputs(kb, 2, 3, 10, 10)
    out2 = reg_pos(h_pred2, h_label2)
    jax.block_until_ready(out2)
    ref2 = _reg_pos_ref(h_pred2, h_label2)
    assert jnp.allclose(out2, ref2, rtol=1e-5, atol=1e-5), (out2, ref2)

    # 3) Forced tiny blocks -> multi-block grid + ragged row masking path.
    h_pred3, h_label3 = _make_inputs(kc, 20, 4, 16, 16)
    out3 = reg_pos(h_pred3, h_label3, target_block_bytes=4096)
    jax.block_until_ready(out3)
    ref3 = _reg_pos_ref(h_pred3, h_label3)
    assert jnp.allclose(out3, ref3, rtol=1e-5, atol=1e-5), (out3, ref3)

    print("KERNEL_OK")
</pallas_src>

<mosaic_0001>
module attributes {stable_mosaic.version = 11 : i64} {
  func.func @_reg_pos_kernel(%arg0: i32, %arg1: i32, %arg2: memref<2x128xf32, #tpu.memory_space<vmem>>, %arg3: memref<2x128xf32, #tpu.memory_space<vmem>>, %arg4: memref<2x128xf32, #tpu.memory_space<vmem>>, %arg5: memref<1x1x8x128xf32, #tpu.memory_space<vmem>>) attributes {dimension_semantics = [#tpu.dimension_semantics<parallel>, #tpu.dimension_semantics<parallel>], iteration_bounds = array<i64: 1, 2>, scalar_prefetch = 0 : i64, scratch_operands = 0 : i64, tpu.core_type = #tpu.core_type<tc>, window_params = [{transform_indices = @transform_0, window_bounds = array<i64: 2, 128>}, {transform_indices = @transform_1, window_bounds = array<i64: 2, 128>}, {transform_indices = @transform_2, window_bounds = array<i64: 2, 128>}, {transform_indices = @transform_3, window_bounds = array<i64: 1, 1, 8, 128>}]} {
    %c0 = arith.constant 0 : index
    %c0_0 = arith.constant 0 : index
    %0 = vector.load %arg2[%c0, %c0_0] : memref<2x128xf32, #tpu.memory_space<vmem>>, vector<2x128xf32>
    %c0_1 = arith.constant 0 : index
    %c0_2 = arith.constant 0 : index
    %1 = vector.load %arg3[%c0_1, %c0_2] : memref<2x128xf32, #tpu.memory_space<vmem>>, vector<2x128xf32>
    %c0_3 = arith.constant 0 : index
    %c0_4 = arith.constant 0 : index
    %2 = vector.load %arg4[%c0_3, %c0_4] : memref<2x128xf32, #tpu.memory_space<vmem>>, vector<2x128xf32>
    %cst = arith.constant 1.000000e-10 : f32
    %3 = vector.broadcast %cst : f32 to vector<2x128xf32>
    %4 = arith.addf %1, %3 : vector<2x128xf32>
    %5 = arith.subf %0, %1 : vector<2x128xf32>
    %6 = arith.divf %5, %4 : vector<2x128xf32>
    %7 = math.absf %6 : vector<2x128xf32>
    %cst_5 = arith.constant 1.000000e+00 : f32
    %8 = vector.broadcast %cst_5 : f32 to vector<2x128xf32>
    %9 = arith.cmpf olt, %7, %8 : vector<2x128xf32>
    %cst_6 = arith.constant 5.000000e-01 : f32
    %10 = vector.broadcast %cst_6 : f32 to vector<2x128xf32>
    %11 = arith.mulf %10, %6 : vector<2x128xf32>
    %12 = arith.mulf %11, %6 : vector<2x128xf32>
    %cst_7 = arith.constant 5.000000e-01 : f32
    %13 = vector.broadcast %cst_7 : f32 to vector<2x128xf32>
    %14 = arith.subf %7, %13 : vector<2x128xf32>
    %15 = arith.select %9, %12, %14 : vector<2x128xi1>, vector<2x128xf32>
    %16 = arith.mulf %2, %15 : vector<2x128xf32>
    %17 = vector.shape_cast %16 : vector<2x128xf32> to vector<1x2x128xf32>
    %cst_8 = arith.constant dense<0.000000e+00> : vector<1xf32>
    %18 = vector.multi_reduction <add>, %17, %cst_8 [1, 2] : vector<1x2x128xf32> to vector<1xf32>
    %19 = vector.shape_cast %18 : vector<1xf32> to vector<1x1x1xf32>
    %20 = vector.extract %19[0, 0, 0] : f32 from vector<1x1x1xf32>
    %21 = vector.shape_cast %2 : vector<2x128xf32> to vector<1x2x128xf32>
    %cst_9 = arith.constant dense<0.000000e+00> : vector<1xf32>
    %22 = vector.multi_reduction <add>, %21, %cst_9 [1, 2] : vector<1x2x128xf32> to vector<1xf32>
    %23 = vector.shape_cast %22 : vector<1xf32> to vector<1x1x1xf32>
    %24 = vector.extract %23[0, 0, 0] : f32 from vector<1x1x1xf32>
    %25 = tpu.iota {dimensions = array<i32: 0>} : vector<8x128xi32>
    %c4_i32 = arith.constant 4 : i32
    %26 = vector.broadcast %c4_i32 : i32 to vector<8x128xi32>
    %27 = arith.cmpi slt, %25, %26 : vector<8x128xi32>
    %28 = vector.broadcast %20 : f32 to vector<8x128xf32>
    %29 = vector.broadcast %24 : f32 to vector<8x128xf32>
    %30 = arith.select %27, %28, %29 : vector<8x128xi1>, vector<8x128xf32>
    %31 = vector.shape_cast %30 : vector<8x128xf32> to vector<1x1x8x128xf32>
    %c0_10 = arith.constant 0 : index
    %c0_11 = arith.constant 0 : index
    %c0_12 = arith.constant 0 : index
    %c0_13 = arith.constant 0 : index
    %32 = vector.load %arg5[%c0_10, %c0_11, %c0_12, %c0_13] : memref<1x1x8x128xf32, #tpu.memory_space<vmem>>, vector<1x1x8x128xf32>
    tpu.vector_store %arg5[%c0_10, %c0_11, %c0_12, %c0_13], %31 {strides = array<i32>} : memref<1x1x8x128xf32, #tpu.memory_space<vmem>>, vector<1x1x8x128xf32>,
    return
  }
  func.func @transform_0(%arg0: i32, %arg1: i32) -> (i32, i32) {
    %c0_i32 = arith.constant 0 : i32
    return %arg0, %arg1 : i32, i32
  }
  func.func @transform_1(%arg0: i32, %arg1: i32) -> (i32, i32) {
    %c0_i32 = arith.constant 0 : i32
    return %arg0, %arg1 : i32, i32
  }
  func.func @transform_2(%arg0: i32, %arg1: i32) -> (i32, i32) {
    %c2_i32 = arith.constant 2 : i32
    %0 = arith.addi %c2_i32, %arg1 : i32
    %c0_i32 = arith.constant 0 : i32
    return %arg0, %0 : i32, i32
  }
  func.func @transform_3(%arg0: i32, %arg1: i32) -> (i32, i32, i32, i32) {
    %c0_i32 = arith.constant 0 : i32
    %c0_i32_0 = arith.constant 0 : i32
    %c0_i32_1 = arith.constant 0 : i32
    return %arg0, %arg1, %c0_i32, %c0_i32_0 : i32, i32, i32, i32
  }
}

</mosaic_0001>

<bundles_post_ra>
// kernel: tpu_custom_call.1
= control target key start
LH: loop header
LB: loop body
LE: loop exit
PB: predicated region body
PF: predicated region fallthrough
CT: control target
= control target key end

     0   :  { %s1160_s0 = inlined_call_operand.hbm [shape: f32[2,1024], index: 0, kind: input, shape index: {}]   ;;  %s1161_s1 = inlined_call_operand.hbm [shape: f32[2,1024], index: 1, kind: input, shape index: {}]   ;;  %s1162_s2 = inlined_call_operand.hbm [shape: f32[2,1024], index: 2, kind: input, shape index: {}]   ;;  %s1163_s3 = inlined_call_operand.hbm [shape: f32[1,2,8,128], index: 3, kind: output, shape index: {}]  }
   0x1   :  { %1174 = sst [smem:[#allocation17_spill]] %s1161_s1 }
   0x2   :  { %8 = vsyncpa [#allocation3], 0 }
   0x3   :  { %10 = vsyncpa [#allocation3 + $0x1], 0 }
   0x4   :  { %11 = vsyncpa [#allocation6], 0 }
   0x5   :  { %13 = vsyncpa [#allocation6 + $0x1], 0 }
   0x6   :  { %14 = vsyncpa [#allocation4], 0 }
   0x7   :  { %16 = vsyncpa [#allocation4 + $0x1], 0  ;;  %s828_s12 = smov 0   ;;  %s830_s13 = smov 0  }
   0x8   :  { %s832_s14 = smov 0   ;;  %s834_s15 = smov 0  }
   0x9   :  { %s836_s16 = smov 0   ;;  %s838_s17 = smov 0  }
   0xa   :  { %s840_s18 = smov 0   ;;  %s842_s19 = smov 0  }
   0xb   :  { %s844_s20 = smov 0  }
   0xc LB: > { %1175 = sst [smem:[#allocation13_spill]] %s798_s19  ;;  %s874_s21 = sadd.s32 4294967295, %s802_s20   ;;  %s802_s20 = sphi %s844_s20, %s22_s20   ;;  %s798_s19 = sphi %s842_s19, %s1211_s19   ;;  %s794_s18 = sphi %s840_s18, %s1203_s18   ;;  %s790_s17 = sphi %s838_s17, %s1210_s17   ;;  %s786_s16 = sphi %s836_s16, %s1209_s16   ;;  %s782_s15 = sphi %s834_s15, %s1208_s15   ;;  %s778_s14 = sphi %s832_s14, %s1207_s14   ;;  %s774_s13 = sphi %s830_s13, %s1206_s13   ;;  %s770_s12 = sphi %s828_s12, %s1205_s12  }
   0xd   : > { %s476_s22 = sadd.s32 4294967294, %s802_s20   ;;  %s31_s23 = sadd.s32 1, %s798_s19 }
   0xe   : > { %s43_s24 = sadd.s32 1, %s790_s17  ;;  %p32_p0 = scmp.ge.s32.totalorder %s31_s23, 2 }
   0xf   : > { %p50_p1 = scmp.ne.s32.totalorder %s790_s17, %s786_s16  ;;  %p1169_p2 = scmp.eq.s32.totalorder %s802_s20, 0 }
  0x10   : > { %p56_p3 = scmp.ne.s32.totalorder %s786_s16, %s782_s15  ;;  %s1213_s23 = smov (%p32_p0, %s31_s23), 0 }
  0x11   : > { %1176 = sst [smem:[#allocation14_spill]] %s1213_s23  ;;  %p891_p4 = por %p1169_p2, %p50_p1 }
  0x12   : > { %p1168_p5 = scmp.eq.s32.totalorder %s874_s21, 0  ;;  %s39_s26 = ssub.s32 %s798_s19, %s1213_s23 }
  0x13   : > { %s94_s27 = sadd.s32 2, %s798_s19  ;;  %p41_p6 = scmp.eq.s32.totalorder %s39_s26, 0 }
  0x14   : > { %p904_p7 = por %p1168_p5, %p56_p3  ;;  %s95_s29 = sadd.s32 2, %s1213_s23 }
  0x15   : > { %p140_p8 = scmp.eq.s32.totalorder %s874_s21, 1  ;;  %s913_s4 = ssub.s32 %s94_s27, %s95_s29 }
  0x16   : > { %s1178_s28 = scalar_select %p904_p7, 1, 0 }
  0x17   : > { %s911_s30 = scalar_select %p41_p6, %s790_s17, %s43_s24  }
  0x18   : > { %p918_p9 = por %p140_p8, %p50_p1  ;;  %p146_p11 = scmp.eq.s32.totalorder %s476_s22, 1 }
  0x19   : > { %1179 = sst [smem:[#allocation15_spill]] %s911_s30  ;;  %p1167_p13 = scmp.lt.s32.totalorder %s802_s20, 2 }
  0x1a   : > { %s1180_s5 = scalar_select %p918_p9, 1, 0 }
  0x1b   : > { %p928_p0 = por %p146_p11, %p56_p3  ;;  %s1164_s7 = sand.u32 1, %s790_s17  }
  0x1c   : > { %s935_s8 = sshll.u32 %s1164_s7, 1  ;;  %s938_s9 = sshll.u32 %s798_s19, 5 }
  0x1d   : > { %s1181_s6 = scalar_select %p928_p0, 1, 0 }
  0x1e   : > { %p944_p1 = pnand %p1167_p13, %p891_p4  ;;  %s186_s11 = sand.u32 1, %s802_s20  }
  0x1f   : > { %1182 = sst [smem:[#allocation16_spill]] %s1181_s6  ;;  %s1184_s1 = sld [smem:[#allocation17_spill]] }
  0x20   : > { %s190_s27 = scalar_lea.vmem [#allocation5], %s935_s8  ;;  %s960_s29 = scalar_lea.sflag [#allocation6], %s186_s11 }
  0x21   : > { %s199_s25 = sshll.u32 %s190_s27, 4  ;;  %p599_p8 = pneg %p944_p1  ;;  %s957_s25 = int_to_ptr.vmem [resolvable:$true] %s199_s25 }
  0x25   : > { %s953_s26 = scalar_lea.hbm %s1184_s1, %s938_s9  ;;  %s602_s23 = scalar_lea.hbm %s1184_s1, 256 }
  0x26   : > { %s597_s7 = scalar_lea.hbm %s953_s26, 32  ;;  %p603_p13 = scmp.lt.u32.totalorder %s953_s26, %s1184_s1 }
  0x27   : > { %p598_p6 = scmp.ne.s32.totalorder %s953_s26, %s597_s7  ;;  %p604_p5 = scmp.lt.u32.totalorder %s602_s23, %s597_s7 }
  0x28   : > { %p606_p10 = scmp.lt.u32.totalorder %s597_s7, %s953_s26 }
  0x29   : > { %p600_p11 = pnand %p599_p8, %p598_p6  ;;  %p605_p2 = por %p604_p5, %p603_p13 }
  0x2b   : > { %p601_p12 = pneg %p600_p11  ;;  %p607_p3 = por %p606_p10, %p605_p2 }
  0x2d   : > { %p608_p4 = pnand %p607_p3, %p601_p12 }
  0x2f   : > { %611 = shalt.err (!%p608_p4)
}
  0x30   : > { %s612_s11 = scalar_lea.vmem %s957_s25, 32  ;;  %s804_s22 = smov [#allocation5]  }
  0x31   : > { %p613_p6 = scmp.ne.s32.totalorder %s957_s25, %s612_s11  ;;  %s617_s24 = sshll.u32 %s804_s22, 4  ;;  %s618_s24 = int_to_ptr.vmem [resolvable:$false] %s617_s24 }
  0x32   : > { %s619_s19 = scalar_lea.vmem %s618_s24, 64  ;;  %p620_p9 = scmp.lt.s32.totalorder %s957_s25, %s618_s24 }
  0x33   : > { %p615_p11 = pnand %p613_p6, %p599_p8  ;;  %p621_p5 = scmp.lt.s32.totalorder %s619_s19, %s612_s11 }
  0x35   : > { %p616_p0 = pneg %p615_p11  ;;  %p622_p13 = por %p621_p5, %p620_p9 }
  0x37   : > { %p623_p2 = pnand %p622_p13, %p616_p0 }
  0x39   : > { %626 = shalt.err (!%p623_p2)
}
  0x3a   : > { %513 = dma.hbm_to_vmem [thread:$0]  (!%p944_p1), %s953_s26, 32, %s957_s25, %s960_s29  }
  0x3b   : > { %p1185_p10 = scmp.lt.s32.totalorder %s802_s20, 3  ;;  %p1186_p12 = scmp.ge.s32.totalorder %s802_s20, 1 }
  0x3c   : > { %s1000_s11 = scalar_lea.hbm %s1160_s0, %s938_s9  ;;  %s170_s22 = scalar_lea.vmem [#allocation2], %s935_s8 }
  0x3d   : > { %p992_p3 = pnand %p1186_p12, %p1185_p10  ;;  %s179_s24 = sshll.u32 %s170_s22, 4  ;;  %s180_s24 = int_to_ptr.vmem [resolvable:$true] %s179_s24 }
  0x3e   : > { %s1188_s19 = sand.u32 1, %s790_s17   ;;  %s627_s25 = scalar_lea.hbm %s1000_s11, 32 }
  0x3f   : > { %s1187_s23 = scalar_select %p992_p3, 1, 0 }
  0x40   : > { %s167_s26 = scalar_lea.sflag [#allocation3], %s1188_s19  ;;  %p628_p9 = scmp.ne.s32.totalorder %s1000_s11, %s627_s25 }
  0x41   : > { %s632_s7 = scalar_lea.hbm %s1160_s0, 256  ;;  %p633_p6 = scmp.lt.u32.totalorder %s1000_s11, %s1160_s0 }
  0x42   : > { %p630_p0 = pnand %p628_p9, %p599_p8  ;;  %p634_p11 = scmp.lt.u32.totalorder %s632_s7, %s627_s25 }
  0x43   : > { %p636_p13 = scmp.lt.u32.totalorder %s627_s25, %s1000_s11 }
  0x44   : > { %p631_p4 = pneg %p630_p0  ;;  %p635_p5 = por %p634_p11, %p633_p6 }
  0x46   : > { %p637_p2 = por %p636_p13, %p635_p5 }
  0x48   : > { %p638_p10 = pnand %p637_p2, %p631_p4 }
  0x4a   : > { %641 = shalt.err (!%p638_p10)
}
  0x4b   : > { %s642_s8 = scalar_lea.vmem %s180_s24, 32  ;;  %s805_s22 = smov [#allocation2]  }
  0x4c   : > { %p643_p12 = scmp.ne.s32.totalorder %s180_s24, %s642_s8  ;;  %s647_s1 = sshll.u32 %s805_s22, 4  ;;  %s648_s1 = int_to_ptr.vmem [resolvable:$false] %s647_s1 }
  0x4d   : > { %s649_s30 = scalar_lea.vmem %s648_s1, 64  ;;  %p650_p7 = scmp.lt.s32.totalorder %s180_s24, %s648_s1 }
  0x4e   : > { %p645_p9 = pnand %p643_p12, %p599_p8  ;;  %p651_p3 = scmp.lt.s32.totalorder %s649_s30, %s642_s8 }
  0x50   : > { %p646_p0 = pneg %p645_p9  ;;  %p652_p6 = por %p651_p3, %p650_p7 }
  0x52   : > { %p653_p11 = pnand %p652_p6, %p646_p0 }
  0x54   : > { %656 = shalt.err (!%p653_p11)
}
  0x55   : > { %510 = dma.hbm_to_vmem [thread:$0]  (!%p944_p1), %s1000_s11, 32, %s180_s24, %s167_s26  }
  0x56   : > { %s101_s6 = sadd.s32 1, %s778_s14  ;;  %p108_p7 = scmp.ne.s32.totalorder %s778_s14, %s774_s13 }
  0x57   : > { %p1189_p8 = scmp.eq.s32.totalorder %s913_s4, 0  ;;  %p1190_p3 = scmp.eq.s32.totalorder %s802_s20, 0 }
  0x58   : > { %p114_p5 = scmp.ne.s32.totalorder %s774_s13, %s770_s12  ;;  %s208_s10 = sand.u32 1, %s778_s14  }
  0x59   : > { %s1030_s19 = scalar_select %p1189_p8, %s778_s14, %s101_s6  }
  0x5a   : > { %p110_p4 = por %p108_p7, %p1190_p3  ;;  %s392_s27 = scalar_lea.hbm %s1162_s2, %s938_s9 }
  0x5b   : > { %p1191_p13 = scmp.eq.s32.totalorder %s874_s21, 0  ;;  %s483_s22 = sshll.u32 %s208_s10, 1 }
  0x5c   : > { %s1047_s11 = scalar_lea.hbm %s392_s27, 64  ;;  %s210_s4 = scalar_lea.vmem [#allocation7], %s483_s22 }
  0x5d   : > { %p1043_p2 = por %p114_p5, %p1191_p13  ;;  %s220_s24 = sshll.u32 %s210_s4, 4  ;;  %s221_s24 = int_to_ptr.vmem [resolvable:$true] %s220_s24 }
  0x5e   : > { %p1193_p1 = scmp.lt.s32.totalorder %s802_s20, 2  ;;  %s687_s9 = scalar_lea.hbm %s392_s27, 96 }
  0x5f   : > { %s1192_s8 = scalar_select %p1043_p2, 1, 0 }
  0x60   : > { %p1051_p10 = pnand %p1193_p1, %p110_p4  ;;  %p658_p12 = scmp.ne.s32.totalorder %s1047_s11, %s687_s9 }
  0x61   : > { %s662_s30 = scalar_lea.hbm %s1162_s2, 256  ;;  %p663_p11 = scmp.lt.u32.totalorder %s1047_s11, %s1162_s2 }
  0x62   : > { %p659_p9 = pneg %p1051_p10  ;;  %p664_p7 = scmp.lt.u32.totalorder %s662_s30, %s687_s9 }
  0x63   : > { %p666_p3 = scmp.lt.u32.totalorder %s687_s9, %s1047_s11 }
  0x64   : > { %p660_p0 = pnand %p659_p9, %p658_p12  ;;  %p665_p8 = por %p664_p7, %p663_p11 }
  0x66   : > { %p661_p6 = pneg %p660_p0  ;;  %p667_p4 = por %p666_p3, %p665_p8 }
  0x68   : > { %p668_p5 = pnand %p667_p4, %p661_p6 }
  0x6a   : > { %671 = shalt.err (!%p668_p5)
}
  0x6b   : > { %s672_s25 = scalar_lea.vmem %s221_s24, 32  ;;  %s806_s7 = smov [#allocation7]  }
  0x6c   : > { %p673_p13 = scmp.ne.s32.totalorder %s221_s24, %s672_s25  ;;  %s677_s27 = sshll.u32 %s806_s7, 4  ;;  %s678_s27 = int_to_ptr.vmem [resolvable:$false] %s677_s27 }
  0x6d   : > { %s679_s22 = scalar_lea.vmem %s678_s27, 64  ;;  %p680_p0 = scmp.lt.s32.totalorder %s221_s24, %s678_s27 }
  0x6e   : > { %p675_p1 = pnand %p673_p13, %p659_p9  ;;  %p681_p2 = scmp.lt.s32.totalorder %s679_s22, %s672_s25 }
  0x70   : > { %p676_p12 = pneg %p675_p1  ;;  %p682_p7 = por %p681_p2, %p680_p0 }
  0x72   : > { %p683_p11 = pnand %p682_p7, %p676_p12 }
  0x74   : > { %686 = shalt.err (!%p683_p11)
}
  0x75   : > { %516 = dma.hbm_to_vmem [thread:$0]  (!%p1051_p10), %s1047_s11, 32, %s221_s24, %s960_s29  }
  0x76   : > { %p1195_p6 = scmp.ne.s32.totalorder %s1187_s23, 0 }
  0x77   : > { %s1079_s4 = sand.u32 (!%p1195_p6), 1, %s786_s16   ;;  %p1196_p2 = scmp.ne.s32.totalorder (!%p1195_p6), %s1178_s28, 0 }
  0x78   : > { %229 = sbr.rel (%p1195_p6) target bundleno = 383 (0x17f), region = 32  ;;  %s486_s9 = sshll.u32 (!%p1195_p6), %s1079_s4, 1 }
  0x79   : > { %s232_s26 = scalar_lea.sflag (!%p1195_p6), [#allocation3], %s1079_s4  ;;  %s235_s1 = scalar_lea.vmem (!%p1195_p6), [#allocation2], %s486_s9 }
  0x7f   : > { %753 = dma.done.wait (%p1196_p2), %s232_s26, 32  }
  0x80   : > { %755 = vsyncadd (%p1196_p2), %s232_s26, 4294967264  ;;  %s240_s29 = sand.u32 1, %s874_s21   ;;  %s244_s23 = scalar_lea.vmem [#allocation5], %s486_s9 }
  0x81   : > { %s241_s11 = scalar_lea.sflag [#allocation6], %s240_s29 }
  0x82   : > { %757 = dma.done.wait (%p1196_p2), %s241_s11, 32  }
  0x83   : > { %759 = vsyncadd (%p1196_p2), %s241_s11, 4294967264  ;;  %s251_s24 = sand.u32 1, %s774_s13   ;;  %p1197_p10 = scmp.ne.s32.totalorder %s1192_s8, 0 }
  0x84   : > { %s488_s12 = sshll.u32 %s251_s24, 1 }
  0x85   : > { %s253_s30 = scalar_lea.vmem [#allocation7], %s488_s12 }
  0x86   : > { %761 = dma.done.wait (%p1197_p10), %s241_s11, 32  }
  0x87   : > { %763 = vsyncadd (%p1197_p10), %s241_s11, 4294967264  ;;  %v288_v0 = vld [vmem:[%s244_s23] sm:$0x3]  ;;  %v287_v2 = vld [vmem:[%s235_s1] sm:$0x3]  ;;  %vm301_vm1 = vcmask 1041408   ;;  %v322_v29 = vlaneseq }
  0x88   : > { %v290_v1 = vadd.f32 1e-10, %v288_v0  ;;  %v291_v3 = vsub.f32 %v287_v2, %v288_v0  ;;  %v289_v8 = vld [vmem:[%s253_s30] sm:$0x3]  ;;  %s489_s21 = sshll.u32 %s1079_s4, 3  ;;  %s492_s28 = sshll.u32 %s794_s18, 7 }
  0x89   : > { %v312_v14 = vsel %vm301_vm1, %v289_v8, 0.0  ;;  %v323_v30 = vshrl.u32 %v322_v29, 7  ;;  %s285_s6 = scalar_lea.vmem [#allocation8], %s489_s21  ;;  %s1102_s22 = scalar_lea.hbm %s1163_s3, %s492_s28 }
  0x8a   : > { %595 = vrcp.f32 %v290_v1  ;;  %s345_s10 = sshll.u32 %s285_s6, 4  ;;  %s330_s18 = scalar_lea.sflag [#allocation4], %s1079_s4  ;;  %s1104_s10 = int_to_ptr.vmem [resolvable:$true] %s345_s10 }
  0x8b   : > { %vm324_vm2 = vcmp.lt.s32.totalorder %v323_v30, 4  ;;  %s688_s9 = scalar_lea.vmem %s1104_s10, 128  ;;  %p1198_p8 = scmp.ne.s32.totalorder %s1180_s5, 0 }
  0x8c   : > { %p689_p9 = scmp.ne.s32.totalorder %s1104_s10, %s688_s9  ;;  %s807_s26 = smov [#allocation8]  }
  0x8d   : > { %s692_s1 = sshll.u32 %s807_s26, 4  ;;  %s693_s1 = int_to_ptr.vmem [resolvable:$false] %s692_s1 }
  0x8e   : > { %p690_p3 = pnand %p689_p9, %p1198_p8  ;;  %s694_s29 = scalar_lea.vmem %s693_s1, 256 }
  0x8f   : > { %p695_p5 = scmp.lt.s32.totalorder %s1104_s10, %s693_s1  ;;  %p696_p13 = scmp.lt.s32.totalorder %s694_s29, %s688_s9 }
  0x90   : > { %p691_p4 = pneg %p690_p3 }
  0x91   : > { %p697_p1 = por %p696_p13, %p695_p5 }
  0x93   : > { %p698_p12 = pnand %p697_p1, %p691_p4 }
  0x94   : > { %v596_v4 = vpop.eup %595 }
  0x95   : > { %v293_v5 = vmul.f32 %v596_v4, %v291_v3 }
  0x97   : > { %v294_v6 = vand.u32 2147483647, %v293_v5  ;;  %v296_v7 = vmul.f32 0.5, %v293_v5 }
  0x99   : > { %vm295_vm0 = vcmp.lt.f32.partialorder %v294_v6, 1.0  ;;  %v297_v9 = vmul.f32 %v296_v7, %v293_v5  ;;  %v490_v10 = vadd.f32 -0.5, %v294_v6 }
  0x9b   : > { %v299_v11 = vsel %vm295_vm0, %v297_v9, %v490_v10 }
  0x9c   : > { %v300_v12 = vmul.f32 %v299_v11, %v289_v8 }
  0x9e   : > { %v302_v13 = vsel %vm301_vm1, %v300_v12, 0.0 }
  0x9f   : > { %303 = vadd.xlane.f32.xlu0 %v302_v13 }
  0xa3   : > { %313 = vadd.xlane.f32.xlu0 %v312_v14 }
 0x12c   : > { %v304_v15 = vpop.xlane.xlu0 %303 }
 0x12d   : > { %v305_v16 = vrot.slane %v304_v15, 4 }
 0x12f   : > { %v306_v17 = vadd.f32 %v305_v16, %v304_v15 }
 0x130   : > { %v314_v18 = vpop.xlane.xlu0 %313 }
 0x131   : > { %v307_v19 = vrot.slane %v306_v17, 2  ;;  %v315_v20 = vrot.slane %v314_v18, 4 }
 0x133   : > { %v316_v21 = vadd.f32 %v315_v20, %v314_v18  ;;  %v308_v22 = vadd.f32 %v307_v19, %v306_v17 }
 0x135   : > { %v317_v23 = vrot.slane %v316_v21, 2  ;;  %v309_v24 = vrot.slane %v308_v22, 1 }
 0x137   : > { %v318_v25 = vadd.f32 %v317_v23, %v316_v21  ;;  %v310_v26 = vadd.f32 %v309_v24, %v308_v22 }
 0x139   : > { %495 = vpush %v310_v26  ;;  %v319_v27 = vrot.slane %v318_v25, 1 }
 0x13b   : > { %v320_v28 = vadd.f32 %v319_v27, %v318_v25 }
 0x13d   : > { %497 = vpush %v320_v28 }
 0x16a   : > { %s496_s8 = spop %495 }
 0x16b   : > { %v325_v31 = vstv %s496_s8 }
 0x16e   : > { %s498_s25 = spop %497 }
 0x16f   : > { %v326_v32 = vstv %s498_s25 }
 0x170   : > { %v327_v33 = vsel %vm324_vm2, %v325_v31, %v326_v32 }
 0x171   : > { %328 = vst [vmem:[%s285_s6] sm:$0xff] %v327_v33 }
 0x172   : > { %701 = shalt.err (!%p698_p12)
}
 0x173   : > { %s702_s4 = scalar_lea.hbm %s1102_s22, 128  ;;  %s706_s24 = scalar_lea.hbm %s1163_s3, 256 }
 0x174   : > { %p703_p0 = scmp.ne.s32.totalorder %s1102_s22, %s702_s4  ;;  %p707_p6 = scmp.lt.u32.totalorder %s1102_s22, %s1163_s3 }
 0x175   : > { %p708_p2 = scmp.lt.u32.totalorder %s706_s24, %s702_s4  ;;  %p710_p9 = scmp.lt.u32.totalorder %s702_s4, %s1102_s22 }
 0x176   : > { %p704_p7 = pnand %p703_p0, %p1198_p8 }
 0x177   : > { %p709_p10 = por %p708_p2, %p707_p6 }
 0x178   : > { %p705_p11 = pneg %p704_p7 }
 0x179   : > { %p711_p3 = por %p710_p9, %p709_p10 }
 0x17b   : > { %p712_p4 = pnand %p711_p3, %p705_p11 }
 0x17d   : > { %715 = shalt.err (!%p712_p4)
}
 0x17e   : > { %505 = dma.vmem_to_hbm [thread:$0]  (%p1198_p8), %s1104_s10, 128, %s1102_s22, %s330_s18  }
 0x17f PF: > { %s1199_s21 = sld [smem:[#allocation16_spill]]  ;;  %s357_s28 = sand.u32 1, %s782_s15  }
 0x180   : > { %p1201_p13 = scmp.ge.s32.totalorder %s802_s20, 2  ;;  %s358_s8 = scalar_lea.sflag [#allocation4], %s357_s28 }
 0x185   : > { %p1200_p5 = scmp.ne.s32.totalorder %s1199_s21, 0 }
 0x187   : > { %p518_p1 = pnand %p1201_p13, %p1200_p5 }
 0x189   : > { %765 = dma.done.wait (!%p518_p1), %s358_s8, 128  }
 0x18a   : > { %767 = vsyncadd (!%p518_p1), %s358_s8, 4294967168  ;;  %s22_s20 = sadd.s32 1, %s802_s20   ;;  %s1202_s5 = sld [smem:[#allocation15_spill]] }
 0x18b   : > { %p19_p12 = scmp.ge.s32.totalorder %s22_s20, 4   ;;  %s1203_s18 = sld [smem:[#allocation13_spill]] }
 0x18c   : > { %s1204_s6 = sld [smem:[#allocation14_spill]]  ;;  %s1205_s12 = smov %s774_s13 }
 0x18d   : > { %s1206_s13 = smov %s778_s14  ;;  %s1207_s14 = smov %s1030_s19 }
 0x18e   : > { %s1208_s15 = smov %s786_s16  ;;  %s1209_s16 = smov %s790_s17 }
 0x18f   :  { %21 = sbr.rel (!%p19_p12) target bundleno = 12 (0xc), region = 101 }
 0x190   : > { %s1210_s17 = smov %s1202_s5 }
 0x192   : > { %s1211_s19 = smov %s1204_s6 }
 0x196   :  { %363 = vsyncpa [#allocation3], 1 }
 0x197   :  { %365 = vsyncpa [#allocation3 + $0x1], 1 }
 0x198   :  { %366 = vsyncpa [#allocation6], 1 }
 0x199   :  { %368 = vsyncpa [#allocation6 + $0x1], 1 }
 0x19a   :  { %369 = vsyncpa [#allocation4], 1 }
 0x19b   :  { %371 = vsyncpa [#allocation4 + $0x1], 1 }

</bundles_post_ra>
